<compile_context>
chip_gen: v5e
topology: v5e:2x2
jax: 0.10.0
libtpu: 0.0.40
codegen_flags: <defaults>
</compile_context>

<pallas_src>
import math

import jax
import jax.numpy as jnp
from jax import lax
from jax.experimental import pallas as pl
from jax.experimental.pallas import tpu as pltpu  # noqa: F401  (no TPU-specific params needed at this size)

N_HEAD = 4
HIDDEN = 32
HEAD_DIM = HIDDEN // N_HEAD
WEIGHT_SPARSITY = 0.9


def attn_kernel(x_ref, wqkv_ref, bqkv_ref, mask_ref, wp_ref, bp_ref, out_ref):
    x = x_ref[...]                                                   # (N, C) f32
    # Fused q/k/v projection: one MXU matmul.  Scale 1/sqrt(D) is pre-folded
    # into the q columns of wqkv/bqkv wrapper-side.
    qkv = jnp.dot(x, wqkv_ref[...],
                  preferred_element_type=jnp.float32) + bqkv_ref[...]  # (N, 3C)

    mask = mask_ref[...]                                             # (N, N) additive, 0 / -1e30

    head_ctx = []
    for h in range(N_HEAD):                                          # static unroll
        qh = qkv[:, h * HEAD_DIM:(h + 1) * HEAD_DIM]                 # (N, D)
        kh = qkv[:, (N_HEAD + h) * HEAD_DIM:(N_HEAD + h + 1) * HEAD_DIM]
        vh = qkv[:, (2 * N_HEAD + h) * HEAD_DIM:(2 * N_HEAD + h + 1) * HEAD_DIM]

        # q @ k^T without materializing a transpose (contracting dim 1 vs 1).
        s = lax.dot_general(qh, kh, (((1,), (1,)), ((), ())),
                            preferred_element_type=jnp.float32)      # (N, N)
        s = s + mask                                                 # block-diag causal
        s = s - jnp.max(s, axis=-1, keepdims=True)
        p = jnp.exp(s)

        ctx = jnp.dot(p, vh, preferred_element_type=jnp.float32)     # (N, D)
        # Normalize AFTER the PV matmul (512 elems instead of 1024); exact recip.
        ctx = ctx * pl.reciprocal(jnp.sum(p, axis=-1, keepdims=True), approx=False)
        head_ctx.append(ctx)

    # Recombine heads along lanes, then a single MXU output projection.
    y = jnp.concatenate(head_ctx, axis=-1)                           # (N, C)
    out = jnp.dot(y, wp_ref[...], preferred_element_type=jnp.float32) + bp_ref[...]
    out_ref[...] = out.astype(out_ref.dtype)


def pack_params(params, batch, seq_len):
    """Wrapper-side (free) re-layout of the module parameters for the kernel."""
    wq, bq, wk, bk, wv, bv, wp, bp = params
    scale = 1.0 / math.sqrt(HEAD_DIM)
    w_qkv = jnp.concatenate([wq * scale, wk, wv], axis=1)            # (C, 3C)
    b_qkv = jnp.concatenate([bq * scale, bk, bv], axis=1)            # (1, 3C)

    # Block-diagonal causal mask over the flattened (B*T) token axis as an
    # additive bias: 0 where attend, -1e30 where masked (every row keeps its
    # diagonal, so no all-masked rows).
    n = batch * seq_len
    row = jnp.arange(n)[:, None]
    col = jnp.arange(n)[None, :]
    keep = (row >= col) & ((row // seq_len) == (col // seq_len))
    mask = jnp.where(keep, 0.0, -1e30).astype(jnp.float32)           # (N, N)
    return w_qkv, b_qkv, mask, wp, bp


def sparse_causal_self_attention(x, params):
    B, T, C = x.shape
    w_qkv, b_qkv, mask, wp, bp = pack_params(params, B, T)
    n = B * T
    # Advisory cost hint for the XLA scheduler around this ~1 us custom call.
    flops = 2 * n * C * (3 * C) + N_HEAD * (2 * n * n * HEAD_DIM) * 2 + 2 * n * C * C
    bytes_accessed = 4 * (n * C * 2 + C * 3 * C + 3 * C + n * n + C * C + C)
    cost = pl.CostEstimate(flops=flops,
                           transcendentals=N_HEAD * n * n,
                           bytes_accessed=bytes_accessed)
    out2d = pl.pallas_call(
        attn_kernel,
        out_shape=jax.ShapeDtypeStruct((n, C), x.dtype),
        cost_estimate=cost,
        # gridless: whole arrays as single VMEM blocks (default BlockSpecs)
    )(x.reshape(n, C), w_qkv, b_qkv, mask, wp, bp)
    return out2d.reshape(B, T, C)


def init_params(key):
    """Deterministic synthetic init matching the module's shapes.

    nn.Linear(hidden, hidden) -> weight (hidden, hidden), bias (hidden,).
    SparseWeights(sparsity=0.9) -> zero out 90% of the weight entries.
    Weights stored transposed as (in_features, out_features): y = x @ W + b.
    """
    ks = jax.random.split(key, 12)
    bound = 1.0 / math.sqrt(HIDDEN)

    def dense(kw, kb):
        w = jax.random.uniform(kw, (HIDDEN, HIDDEN), jnp.float32, -bound, bound)
        b = jax.random.uniform(kb, (1, HIDDEN), jnp.float32, -bound, bound)
        return w, b

    def sparse(kw, kb, km):
        w, b = dense(kw, kb)
        keep = jax.random.bernoulli(km, p=1.0 - WEIGHT_SPARSITY, shape=w.shape)
        return w * keep.astype(w.dtype), b

    wq, bq = sparse(ks[0], ks[1], ks[2])
    wk, bk = sparse(ks[3], ks[4], ks[5])
    wv, bv = sparse(ks[6], ks[7], ks[8])
    wp, bp = dense(ks[9], ks[10])
    return (wq, bq, wk, bk, wv, bv, wp, bp)


def reference(x, params):
    """Pure-JAX reference of the PyTorch forward (dropout p=0)."""
    wq, bq, wk, bk, wv, bv, wp, bp = params
    B, T, C = x.shape
    q = (x @ wq + bq).reshape(B, T, N_HEAD, HEAD_DIM).transpose(0, 2, 1, 3)
    k = (x @ wk + bk).reshape(B, T, N_HEAD, HEAD_DIM).transpose(0, 2, 1, 3)
    v = (x @ wv + bv).reshape(B, T, N_HEAD, HEAD_DIM).transpose(0, 2, 1, 3)
    att = jnp.einsum('bhqd,bhkd->bhqk', q, k) / math.sqrt(HEAD_DIM)
    mask = jnp.tril(jnp.ones((T, T), bool))
    att = jnp.where(mask, att, -jnp.inf)
    att = jax.nn.softmax(att, axis=-1)
    y = jnp.einsum('bhqk,bhkd->bhqd', att, v).transpose(0, 2, 1, 3).reshape(B, T, C)
    return y @ wp + bp


if __name__ == "__main__":
    key = jax.random.PRNGKey(0)
    k_x, k_p = jax.random.split(key)

    B, T, C = 2, 8, HIDDEN
    x = jax.random.normal(k_x, (B, T, C), dtype=jnp.float32)
    params = init_params(k_p)

    out = jax.block_until_ready(sparse_causal_self_attention(x, params))
    ref = reference(x, params)

    assert out.shape == (B, T, C)
    # Exact softmax reciprocal -> f32-tight agreement with the reference.
    assert jnp.allclose(out, ref, atol=1e-4, rtol=1e-4), "mismatch vs reference"

    print("KERNEL_OK")
</pallas_src>

<mosaic_0001>
module attributes {stable_mosaic.version = 11 : i64} {
  func.func @attn_kernel(%arg0: memref<16x32xf32, #tpu.memory_space<vmem>>, %arg1: memref<32x96xf32, #tpu.memory_space<vmem>>, %arg2: memref<1x96xf32, #tpu.memory_space<vmem>>, %arg3: memref<16x16xf32, #tpu.memory_space<vmem>>, %arg4: memref<32x32xf32, #tpu.memory_space<vmem>>, %arg5: memref<1x32xf32, #tpu.memory_space<vmem>>, %arg6: memref<16x32xf32, #tpu.memory_space<vmem>>) attributes {dimension_semantics = [], scalar_prefetch = 0 : i64, scratch_operands = 0 : i64, tpu.core_type = #tpu.core_type<tc>} {
    %c0 = arith.constant 0 : index
    %c0_0 = arith.constant 0 : index
    %0 = vector.load %arg0[%c0, %c0_0] : memref<16x32xf32, #tpu.memory_space<vmem>>, vector<16x32xf32>
    %c0_1 = arith.constant 0 : index
    %c0_2 = arith.constant 0 : index
    %1 = vector.load %arg1[%c0_1, %c0_2] : memref<32x96xf32, #tpu.memory_space<vmem>>, vector<32x96xf32>
    %cst = arith.constant dense<0.000000e+00> : vector<16x96xf32>
    %2 = tpu.matmul %0, %1, %cst {dimension_numbers = #tpu.dot_dimension_numbers<[1], [0], [0], [1], [0, 0, 1, 1], [], []>} : vector<16x32xf32>, vector<32x96xf32>, vector<16x96xf32> -> vector<16x96xf32>
    %c0_3 = arith.constant 0 : index
    %c0_4 = arith.constant 0 : index
    %3 = vector.load %arg2[%c0_3, %c0_4] : memref<1x96xf32, #tpu.memory_space<vmem>>, vector<1x96xf32>
    %4 = vector.broadcast %3 : vector<1x96xf32> to vector<16x96xf32>
    %5 = arith.addf %2, %4 : vector<16x96xf32>
    %c0_5 = arith.constant 0 : index
    %c0_6 = arith.constant 0 : index
    %6 = vector.load %arg3[%c0_5, %c0_6] : memref<16x16xf32, #tpu.memory_space<vmem>>, vector<16x16xf32>
    %7 = vector.extract_strided_slice %5 {offsets = [0, 0], sizes = [16, 8], strides = [1, 1]} : vector<16x96xf32> to vector<16x8xf32>
    %8 = vector.extract_strided_slice %5 {offsets = [0, 32], sizes = [16, 8], strides = [1, 1]} : vector<16x96xf32> to vector<16x8xf32>
    %9 = vector.extract_strided_slice %5 {offsets = [0, 64], sizes = [16, 8], strides = [1, 1]} : vector<16x96xf32> to vector<16x8xf32>
    %cst_7 = arith.constant dense<0.000000e+00> : vector<16x16xf32>
    %10 = tpu.matmul %7, %8, %cst_7 {dimension_numbers = #tpu.dot_dimension_numbers<[1], [1], [0], [0], [0, 0, 1, 0], [], []>} : vector<16x8xf32>, vector<16x8xf32>, vector<16x16xf32> -> vector<16x16xf32>
    %11 = arith.addf %10, %6 : vector<16x16xf32>
    %cst_8 = arith.constant dense<0xFF800000> : vector<16xf32>
    %12 = vector.multi_reduction <maximumf>, %11, %cst_8 [1] : vector<16x16xf32> to vector<16xf32>
    %13 = vector.shape_cast %12 : vector<16xf32> to vector<16x1xf32>
    %14 = vector.broadcast %13 : vector<16x1xf32> to vector<16x16xf32>
    %15 = arith.subf %11, %14 : vector<16x16xf32>
    %16 = math.exp %15 : vector<16x16xf32>
    %cst_9 = arith.constant dense<0.000000e+00> : vector<16x8xf32>
    %17 = tpu.matmul %16, %9, %cst_9 {dimension_numbers = #tpu.dot_dimension_numbers<[1], [0], [0], [1], [0, 0, 1, 1], [], []>} : vector<16x16xf32>, vector<16x8xf32>, vector<16x8xf32> -> vector<16x8xf32>
    %cst_10 = arith.constant dense<0.000000e+00> : vector<16xf32>
    %18 = vector.multi_reduction <add>, %16, %cst_10 [1] : vector<16x16xf32> to vector<16xf32>
    %19 = vector.shape_cast %18 : vector<16xf32> to vector<16x1xf32>
    %20 = tpu.reciprocal %19 : vector<16x1xf32> -> vector<16x1xf32>
    %21 = vector.broadcast %20 : vector<16x1xf32> to vector<16x8xf32>
    %22 = arith.mulf %17, %21 : vector<16x8xf32>
    %23 = vector.extract_strided_slice %5 {offsets = [0, 8], sizes = [16, 8], strides = [1, 1]} : vector<16x96xf32> to vector<16x8xf32>
    %24 = vector.extract_strided_slice %5 {offsets = [0, 40], sizes = [16, 8], strides = [1, 1]} : vector<16x96xf32> to vector<16x8xf32>
    %25 = vector.extract_strided_slice %5 {offsets = [0, 72], sizes = [16, 8], strides = [1, 1]} : vector<16x96xf32> to vector<16x8xf32>
    %cst_11 = arith.constant dense<0.000000e+00> : vector<16x16xf32>
    %26 = tpu.matmul %23, %24, %cst_11 {dimension_numbers = #tpu.dot_dimension_numbers<[1], [1], [0], [0], [0, 0, 1, 0], [], []>} : vector<16x8xf32>, vector<16x8xf32>, vector<16x16xf32> -> vector<16x16xf32>
    %27 = arith.addf %26, %6 : vector<16x16xf32>
    %cst_12 = arith.constant dense<0xFF800000> : vector<16xf32>
    %28 = vector.multi_reduction <maximumf>, %27, %cst_12 [1] : vector<16x16xf32> to vector<16xf32>
    %29 = vector.shape_cast %28 : vector<16xf32> to vector<16x1xf32>
    %30 = vector.broadcast %29 : vector<16x1xf32> to vector<16x16xf32>
    %31 = arith.subf %27, %30 : vector<16x16xf32>
    %32 = math.exp %31 : vector<16x16xf32>
    %cst_13 = arith.constant dense<0.000000e+00> : vector<16x8xf32>
    %33 = tpu.matmul %32, %25, %cst_13 {dimension_numbers = #tpu.dot_dimension_numbers<[1], [0], [0], [1], [0, 0, 1, 1], [], []>} : vector<16x16xf32>, vector<16x8xf32>, vector<16x8xf32> -> vector<16x8xf32>
    %cst_14 = arith.constant dense<0.000000e+00> : vector<16xf32>
    %34 = vector.multi_reduction <add>, %32, %cst_14 [1] : vector<16x16xf32> to vector<16xf32>
    %35 = vector.shape_cast %34 : vector<16xf32> to vector<16x1xf32>
    %36 = tpu.reciprocal %35 : vector<16x1xf32> -> vector<16x1xf32>
    %37 = vector.broadcast %36 : vector<16x1xf32> to vector<16x8xf32>
    %38 = arith.mulf %33, %37 : vector<16x8xf32>
    %39 = vector.extract_strided_slice %5 {offsets = [0, 16], sizes = [16, 8], strides = [1, 1]} : vector<16x96xf32> to vector<16x8xf32>
    %40 = vector.extract_strided_slice %5 {offsets = [0, 48], sizes = [16, 8], strides = [1, 1]} : vector<16x96xf32> to vector<16x8xf32>
    %41 = vector.extract_strided_slice %5 {offsets = [0, 80], sizes = [16, 8], strides = [1, 1]} : vector<16x96xf32> to vector<16x8xf32>
    %cst_15 = arith.constant dense<0.000000e+00> : vector<16x16xf32>
    %42 = tpu.matmul %39, %40, %cst_15 {dimension_numbers = #tpu.dot_dimension_numbers<[1], [1], [0], [0], [0, 0, 1, 0], [], []>} : vector<16x8xf32>, vector<16x8xf32>, vector<16x16xf32> -> vector<16x16xf32>
    %43 = arith.addf %42, %6 : vector<16x16xf32>
    %cst_16 = arith.constant dense<0xFF800000> : vector<16xf32>
    %44 = vector.multi_reduction <maximumf>, %43, %cst_16 [1] : vector<16x16xf32> to vector<16xf32>
    %45 = vector.shape_cast %44 : vector<16xf32> to vector<16x1xf32>
    %46 = vector.broadcast %45 : vector<16x1xf32> to vector<16x16xf32>
    %47 = arith.subf %43, %46 : vector<16x16xf32>
    %48 = math.exp %47 : vector<16x16xf32>
    %cst_17 = arith.constant dense<0.000000e+00> : vector<16x8xf32>
    %49 = tpu.matmul %48, %41, %cst_17 {dimension_numbers = #tpu.dot_dimension_numbers<[1], [0], [0], [1], [0, 0, 1, 1], [], []>} : vector<16x16xf32>, vector<16x8xf32>, vector<16x8xf32> -> vector<16x8xf32>
    %cst_18 = arith.constant dense<0.000000e+00> : vector<16xf32>
    %50 = vector.multi_reduction <add>, %48, %cst_18 [1] : vector<16x16xf32> to vector<16xf32>
    %51 = vector.shape_cast %50 : vector<16xf32> to vector<16x1xf32>
    %52 = tpu.reciprocal %51 : vector<16x1xf32> -> vector<16x1xf32>
    %53 = vector.broadcast %52 : vector<16x1xf32> to vector<16x8xf32>
    %54 = arith.mulf %49, %53 : vector<16x8xf32>
    %55 = vector.extract_strided_slice %5 {offsets = [0, 24], sizes = [16, 8], strides = [1, 1]} : vector<16x96xf32> to vector<16x8xf32>
    %56 = vector.extract_strided_slice %5 {offsets = [0, 56], sizes = [16, 8], strides = [1, 1]} : vector<16x96xf32> to vector<16x8xf32>
    %57 = vector.extract_strided_slice %5 {offsets = [0, 88], sizes = [16, 8], strides = [1, 1]} : vector<16x96xf32> to vector<16x8xf32>
    %cst_19 = arith.constant dense<0.000000e+00> : vector<16x16xf32>
    %58 = tpu.matmul %55, %56, %cst_19 {dimension_numbers = #tpu.dot_dimension_numbers<[1], [1], [0], [0], [0, 0, 1, 0], [], []>} : vector<16x8xf32>, vector<16x8xf32>, vector<16x16xf32> -> vector<16x16xf32>
    %59 = arith.addf %58, %6 : vector<16x16xf32>
    %cst_20 = arith.constant dense<0xFF800000> : vector<16xf32>
    %60 = vector.multi_reduction <maximumf>, %59, %cst_20 [1] : vector<16x16xf32> to vector<16xf32>
    %61 = vector.shape_cast %60 : vector<16xf32> to vector<16x1xf32>
    %62 = vector.broadcast %61 : vector<16x1xf32> to vector<16x16xf32>
    %63 = arith.subf %59, %62 : vector<16x16xf32>
    %64 = math.exp %63 : vector<16x16xf32>
    %cst_21 = arith.constant dense<0.000000e+00> : vector<16x8xf32>
    %65 = tpu.matmul %64, %57, %cst_21 {dimension_numbers = #tpu.dot_dimension_numbers<[1], [0], [0], [1], [0, 0, 1, 1], [], []>} : vector<16x16xf32>, vector<16x8xf32>, vector<16x8xf32> -> vector<16x8xf32>
    %cst_22 = arith.constant dense<0.000000e+00> : vector<16xf32>
    %66 = vector.multi_reduction <add>, %64, %cst_22 [1] : vector<16x16xf32> to vector<16xf32>
    %67 = vector.shape_cast %66 : vector<16xf32> to vector<16x1xf32>
    %68 = tpu.reciprocal %67 : vector<16x1xf32> -> vector<16x1xf32>
    %69 = vector.broadcast %68 : vector<16x1xf32> to vector<16x8xf32>
    %70 = arith.mulf %65, %69 : vector<16x8xf32>
    %71 = tpu.concatenate %22, %38, %54, %70 in 1 : vector<16x8xf32>, vector<16x8xf32>, vector<16x8xf32>, vector<16x8xf32> -> vector<16x32xf32>
    %c0_23 = arith.constant 0 : index
    %c0_24 = arith.constant 0 : index
    %72 = vector.load %arg4[%c0_23, %c0_24] : memref<32x32xf32, #tpu.memory_space<vmem>>, vector<32x32xf32>
    %cst_25 = arith.constant dense<0.000000e+00> : vector<16x32xf32>
    %73 = tpu.matmul %71, %72, %cst_25 {dimension_numbers = #tpu.dot_dimension_numbers<[1], [0], [0], [1], [0, 0, 1, 1], [], []>} : vector<16x32xf32>, vector<32x32xf32>, vector<16x32xf32> -> vector<16x32xf32>
    %c0_26 = arith.constant 0 : index
    %c0_27 = arith.constant 0 : index
    %74 = vector.load %arg5[%c0_26, %c0_27] : memref<1x32xf32, #tpu.memory_space<vmem>>, vector<1x32xf32>
    %75 = vector.broadcast %74 : vector<1x32xf32> to vector<16x32xf32>
    %76 = arith.addf %73, %75 : vector<16x32xf32>
    %c0_28 = arith.constant 0 : index
    %c0_29 = arith.constant 0 : index
    %77 = vector.load %arg6[%c0_28, %c0_29] : memref<16x32xf32, #tpu.memory_space<vmem>>, vector<16x32xf32>
    tpu.vector_store %arg6[%c0_28, %c0_29], %76 {strides = array<i32>} : memref<16x32xf32, #tpu.memory_space<vmem>>, vector<16x32xf32>,
    return
  }
}

</mosaic_0001>

<bundles_post_ra>
// kernel: tpu_custom_call.1
= control target key start
LH: loop header
LB: loop body
LE: loop exit
PB: predicated region body
PF: predicated region fallthrough
CT: control target
= control target key end

     0   :  { %11 = vsyncpa [#allocation3], 0  ;;  %s1128_s0 = inlined_call_operand.hbm [shape: f32[16,32], index: 0, kind: input, shape index: {}]   ;;  %s1129_s1 = inlined_call_operand.hbm [shape: f32[32,96], index: 1, kind: input, shape index: {}]   ;;  %s1130_s2 = inlined_call_operand.vmem [shape: f32[1,96], index: 2, kind: input, shape index: {}]   ;;  %s1131_s3 = inlined_call_operand.hbm [shape: f32[16,16], index: 3, kind: input, shape index: {}]   ;;  %s1132_s4 = inlined_call_operand.hbm [shape: f32[32,32], index: 4, kind: input, shape index: {}]   ;;  %s1133_s5 = inlined_call_operand.vmem [shape: f32[1,32], index: 5, kind: input, shape index: {}]   ;;  %s1134_s6 = inlined_call_operand.hbm [shape: f32[16,32], index: 6, kind: output, shape index: {}]  }
   0x1   :  { %12 = vsyncpa [#allocation6], 0 }
   0x2   :  { %13 = vsyncpa [#allocation9], 0 }
   0x3   :  { %14 = vsyncpa [#allocation4], 0  ;;  %s32_s23 = sshll.u32 %s1129_s1, 4  ;;  %s944_s24 = smov [#allocation5]   ;;  %s33_s23 = int_to_ptr.hbm [resolvable:$true] %s32_s23 }
   0x4   :  { %s34_s25 = sshll.u32 %s944_s24, 4  ;;  %s19_s28 = sshll.u32 %s1128_s0, 4  ;;  %s35_s25 = int_to_ptr.vmem [resolvable:$true] %s34_s25  ;;  %s20_s28 = int_to_ptr.hbm [resolvable:$true] %s19_s28 }
   0x5   :  { %s945_s29 = smov 128   ;;  %s946_s30 = smov 8  }
   0x6   :  { %40 = dma.hbm_to_vmem [thread:$0]  %s33_s23, 512, %s35_s25, [#allocation6], %s945_s29, %s945_s29, %s946_s30  }
   0x7   :  { %s947_s7 = smov [#allocation2]   ;;  %s47_s1 = sshll.u32 %s1131_s3, 4  ;;  %s48_s1 = int_to_ptr.hbm [resolvable:$true] %s47_s1 }
   0x8   :  { %s21_s8 = sshll.u32 %s947_s7, 4  ;;  %s60_s12 = sshll.u32 %s1132_s4, 4  ;;  %s22_s8 = int_to_ptr.vmem [resolvable:$true] %s21_s8  ;;  %s61_s12 = int_to_ptr.hbm [resolvable:$true] %s60_s12 }
   0x9   :  { %27 = dma.hbm_to_vmem [thread:$0]  %s20_s28, 256, %s22_s8, [#allocation3], %s945_s29, %s945_s29, %s946_s30  }
   0xa   :  { %s948_s13 = smov [#allocation7]   ;;  %s949_s15 = smov [#allocation8]  }
   0xb   :  { %s49_s14 = sshll.u32 %s948_s13, 4  ;;  %s62_s3 = sshll.u32 %s949_s15, 4  ;;  %s50_s14 = int_to_ptr.vmem [resolvable:$true] %s49_s14  ;;  %s63_s3 = int_to_ptr.vmem [resolvable:$true] %s62_s3 }
   0xc   :  { %55 = dma.hbm_to_vmem [thread:$0]  %s48_s1, 256, %s50_s14, [#allocation6], %s945_s29, %s945_s29, %s946_s30  }
   0xd   :  { %68 = dma.hbm_to_vmem [thread:$0]  %s61_s12, 512, %s63_s3, [#allocation9], %s945_s29, %s945_s29, %s946_s30  }
   0xe   :  { %936 = dma.done.wait [#allocation3], 256  }
   0xf   :  { %937 = vsyncadd [#allocation3], 4294967040 }
  0x10   :  { %938 = dma.done.wait [#allocation6], 768  }
  0x11   :  { %939 = vsyncadd [#allocation6], 4294966528 }
  0x12   :  { %940 = dma.done.wait [#allocation9], 512  }
  0x13   :  { %941 = vsyncadd [#allocation9], 4294966784  ;;  %v92_v0 = vld [vmem:[#allocation5 + $0x18] sm:$0xff]  ;;  %v91_v1 = vld [vmem:[#allocation5 + $0x10] sm:$0xff]  ;;  %vm97_vm0 = vcmask 261120   ;;  %s950_s17 = smov 88  }
  0x14   :  { %116 = vmatpush.msra.mxu0 %v92_v0  ;;  %736 = vmatpush.msra.mxu1 %v92_v0  ;;  %v90_v2 = vld [vmem:[#allocation5 + $0x8] sm:$0xff]  ;;  %v89_v3 = vld [vmem:[#allocation5] sm:$0xff]  ;;  %v87_v4 = vld [vmem:[#allocation2] sm:$0xff]  ;;  %s951_s18 = smov 96   ;;  %s952_s19 = smov 120   ;;  %vm135_vm1 = vcmask 64512  }
  0x15   :  { %v88_v5 = vld [vmem:[#allocation2 + $0x8] sm:$0xff]  ;;  %v782_v6 = vld [vmem:[%s1130_s2] ss:$0 sm:$0xff]  ;;  %s953_s20 = smov 72   ;;  %s954_s21 = smov 80   ;;  %v1040_v19 = vld [vmem:[#allocation7] sm:$0xff] }
  0x16   :  { %117 = vmatpush.msra.mxu0 %v91_v1  ;;  %737 = vmatpush.msra.mxu1 %v91_v1  ;;  %s955_s2 = smov 104   ;;  %s956_s22 = smov 112   ;;  %vm167_vm2 = vcmask 130048   ;;  %v1044_v23 = vld [vmem:[#allocation7 + $0x8] sm:$0xff] }
  0x17   :  { %s957_s23 = smov 56   ;;  %s958_s24 = smov 64  }
  0x18   :  { %118 = vmatpush.msra.mxu0 %v90_v2  ;;  %738 = vmatpush.msra.mxu1 %v90_v2  ;;  %s959_s25 = smov 48   ;;  %s960_s26 = smov 40  }
  0x19   :  { %s961_s27 = smov 16   ;;  %s962_s28 = smov 24  }
  0x1a   :  { %119 = vmatpush.msra.mxu0 %v89_v3  ;;  %739 = vmatpush.msra.mxu1 %v89_v3  ;;  %s963_s9 = smov [#allocation10]   ;;  %s693_s11 = sshll.u32 %s1134_s6, 4  ;;  %s694_s11 = int_to_ptr.hbm [resolvable:$true] %s693_s11 }
  0x1b   :  { %708 = vmatmul.msk.f32.vlgmr.msra.gmra.mxu0 %vm97_vm0, %v87_v4  ;;  %709 = vmatmul.msk.f32.vlgmr.msra.gmra.mxu1 %vm97_vm0, %v88_v5  ;;  %s691_s10 = sshll.u32 %s963_s9, 4  ;;  %s692_s10 = int_to_ptr.vmem [resolvable:$true] %s691_s10 }
  0x98   :  { %v124_v7 = vpop.f32.mrf.mxu1  ;;  %v121_v9 = vpop.f32.mrf.mxu0 }
  0x99   :  { %v125_v8 = vadd.f32 %v782_v6, %v124_v7  ;;  %v122_v10 = vadd.f32 %v782_v6, %v121_v9 }
  0x9b   :  { %257 = vrot.lane.b32.xlu2 %v125_v8, %s950_s17  ;;  %133 = vrot.lane.b32.xlu0 %v125_v8, %s951_s18  ;;  %v1030_v11 = vpack.i.bf16 %v122_v10, %v125_v8 }
  0xa3   :  { %255 = vrot.lane.b32.xlu2 %v122_v10, %s950_s17  ;;  %131 = vrot.lane.b32.xlu0 %v122_v10, %s951_s18 }
  0xab   :  { %253 = vrot.lane.b32.xlu2 %v125_v8, %s952_s19  ;;  %251 = vrot.lane.b32.xlu0 %v122_v10, %s952_s19 }
  0xb3   :  { %499 = vrot.lane.b32.xlu2 %v122_v10, %s953_s20  ;;  %501 = vrot.lane.b32.xlu0 %v125_v8, %s953_s20 }
  0xbb   :  { %379 = vrot.lane.b32.xlu2 %v125_v8, %s954_s21  ;;  %495 = vrot.lane.b32.xlu0 %v122_v10, %s955_s2 }
  0xc3   :  { %373 = vrot.lane.b32.xlu2 %v122_v10, %s956_s22  ;;  %497 = vrot.lane.b32.xlu0 %v125_v8, %s955_s2 }
  0xcb   :  { %768 = vrot.lane.b32.xlu2 %v1030_v11, %s957_s23 }
  0xf5   :  { %v258_v12 = vpop.permute.xlu2 %257 }
  0xfd   :  { %v256_v13 = vpop.permute.xlu2 %255 }
 0x105   :  { %v1033_v14 = vpop.permute.xlu2 %253 }
 0x10d   :  { %v134_v15 = vpop.permute.xlu0 %133  ;;  %v500_v16 = vpop.permute.xlu2 %499 }
 0x10e   :  { %710 = vmatpush.xpose.msk.msrb.mxu1 %vm135_vm1, %v134_v15 }
 0x115   :  { %v380_v17 = vpop.permute.xlu2 %379  ;;  %v132_v18 = vpop.permute.xlu0 %131 }
 0x116   :  { %711 = vmatpush.xpose.msk.msrb.mxu1 %vm135_vm1, %v132_v18  ;;  %722 = vmatpush.xpose.msk.msrb.mxu0 %vm135_vm1, %v380_v17 }
 0x119   :  { %712 = vmatmul.msk.f32.vlgmr.msrb.gmra.mxu1 %vm135_vm1, %v122_v10 }
 0x11d   :  { %v252_v27 = vpop.permute.xlu0 %251  ;;  %v374_v35 = vpop.permute.xlu2 %373 }
 0x121   :  { %713 = vmatmul.msk.f32.gmra.mxu1 %vm135_vm1, %v125_v8 }
 0x125   :  { %v502_v28 = vpop.permute.xlu0 %501  ;;  %v769_v40 = vpop.permute.xlu2 %768 }
 0x126   :  { %v770_v44 = vunpack.i.l.bf16 %v769_v40  ;;  %v771_v45 = vunpack.i.h.bf16 %v769_v40 }
 0x12d   :  { %v496_v29 = vpop.permute.xlu0 %495 }
 0x135   :  { %v498_v30 = vpop.permute.xlu0 %497 }
 0x196   :  { %v161_v20 = vpop.f32.mrf.mxu1 }
 0x197   :  { %v162_v21 = vadd.f32 %v161_v20, %v1040_v19 }
 0x199   :  { %v168_v22 = vsel %vm167_vm2, %v162_v21, -inf }
 0x19a   :  { %169 = vmax.xlane.f32.xlu0 %v168_v22 }
 0x19e   :  { %v164_v24 = vpop.f32.mrf.mxu1 }
 0x19f   :  { %v165_v25 = vadd.f32 %v164_v24, %v1044_v23 }
 0x1a1   :  { %v171_v26 = vsel %vm167_vm2, %v165_v25, -inf }
 0x1a2   :  { %172 = vmax.xlane.f32.xlu1 %v171_v26 }
 0x1bb   :  { %763 = vrot.lane.b32.xlu1 %v1030_v11, %s958_s24 }
 0x1c3   :  { %377 = vrot.lane.b32.xlu1 %v122_v10, %s954_s21 }
 0x1cb   :  { %375 = vrot.lane.b32.xlu1 %v125_v8, %s956_s22 }
 0x20d   :  { %v170_v31 = vpop.xlane.xlu0 %169 }
 0x20e   :  { %v174_v33 = vsub.f32 %v162_v21, %v170_v31 }
 0x210   :  { %v176_v36 = vmul.f32 1.442695, %v174_v33 }
 0x212   :  { %784 = vpow2.f32 %v176_v36 }
 0x215   :  { %v173_v32 = vpop.xlane.xlu1 %172 }
 0x216   :  { %v175_v34 = vsub.f32 %v165_v25, %v173_v32 }
 0x218   :  { %v178_v37 = vmul.f32 1.442695, %v175_v34  ;;  %v1051_v42 = vpop.eup %784 }
 0x21a   :  { %786 = vpow2.f32 %v178_v37  ;;  %v215_v37 = vsel %vm167_vm2, %v1051_v42, 0.0 }
 0x220   :  { %v1053_v43 = vpop.eup %786 }
 0x221   :  { %v218_v40 = vsel %vm167_vm2, %v1053_v43, 0.0 }
 0x22d   :  { %v764_v38 = vpop.permute.xlu1 %763 }
 0x22e   :  { %v765_v39 = vunpack.i.l.bf16 %v764_v38  ;;  %v766_v41 = vunpack.i.h.bf16 %v764_v38 }
 0x230   :  { %206 = vmatpush.msra.mxu2 %v765_v39  ;;  %740 = vmatpush.msra.mxu3 %v765_v39 }
 0x232   :  { %207 = vmatpush.msra.mxu2 %v766_v41  ;;  %741 = vmatpush.msra.mxu3 %v766_v41 }
 0x233   :  { %714 = vmatmul.msk.f32.vlgmr.msra.gmra.mxu2 %vm167_vm2, %v1051_v42  ;;  %715 = vmatmul.msk.f32.vlgmr.msra.gmra.mxu3 %vm167_vm2, %v1053_v43 }
 0x234   :  { %716 = vmatpush.xpose.msk.msrb.mxu3 %vm135_vm1, %v258_v12  ;;  %328 = vmatpush.msrb.mxu2 %v770_v44 }
 0x235   :  { %v378_v46 = vpop.permute.xlu1 %377 }
 0x236   :  { %329 = vmatpush.msrb.mxu2 %v771_v45  ;;  %723 = vmatpush.xpose.msk.msrb.mxu0 %vm135_vm1, %v378_v46 }
 0x238   :  { %717 = vmatpush.xpose.msk.msrb.mxu3 %vm135_vm1, %v256_v13 }
 0x239   :  { %724 = vmatmul.msk.f32.vlgmr.msrb.gmra.mxu0 %vm135_vm1, %v374_v35 }
 0x23b   :  { %718 = vmatmul.msk.f32.vlgmr.msrb.gmra.mxu3 %vm135_vm1, %v252_v27 }
 0x23c   :  { %728 = vmatpush.xpose.msk.msra.mxu3 %vm135_vm1, %v502_v28 }
 0x23d   :  { %v376_v47 = vpop.permute.xlu1 %375 }
 0x240   :  { %729 = vmatpush.xpose.msk.msra.mxu3 %vm135_vm1, %v500_v16 }
 0x241   :  { %725 = vmatmul.msk.f32.gmra.mxu0 %vm135_vm1, %v376_v47 }
 0x243   :  { %719 = vmatmul.msk.f32.gmra.mxu3 %vm135_vm1, %v1033_v14 }
 0x24b   :  { %730 = vmatmul.msk.f32.vlgmr.msra.gmra.mxu3 %vm135_vm1, %v496_v29 }
 0x253   :  { %731 = vmatmul.msk.f32.gmra.mxu3 %vm135_vm1, %v498_v30 }
 0x2b6   :  { %v1071_v48 = vpop.f32.mrf.mxu3  ;;  %v406_v49 = vpop.f32.mrf.mxu0 }
 0x2b7   :  { %v407_v50 = vadd.f32 %v406_v49, %v1040_v19 }
 0x2b9   :  { %v412_v51 = vsel %vm167_vm2, %v407_v50, -inf }
 0x2ba   :  { %413 = vmax.xlane.f32.xlu1 %v412_v51 }
 0x2be   :  { %v284_v52 = vpop.f32.mrf.mxu3  ;;  %v409_v0 = vpop.f32.mrf.mxu0 }
 0x2bf   :  { %v285_v53 = vadd.f32 %v284_v52, %v1040_v19  ;;  %v410_v1 = vadd.f32 %v409_v0, %v1044_v23  ;;  %v1103_v52 = vpop.f32.mrf.mxu2 }
 0x2c1   :  { %v290_v54 = vsel %vm167_vm2, %v285_v53, -inf  ;;  %v415_v2 = vsel %vm167_vm2, %v410_v1, -inf }
 0x2c2   :  { %291 = vmax.xlane.f32.xlu2 %v290_v54 }
 0x2c6   :  { %v287_v55 = vpop.f32.mrf.mxu3 }
 0x2c7   :  { %v288_v56 = vadd.f32 %v287_v55, %v1044_v23 }
 0x2c9   :  { %v293_v57 = vsel %vm167_vm2, %v288_v56, -inf }
 0x2ca   :  { %294 = vmax.xlane.f32.xlu1 %v293_v57 }
 0x2ce   :  { %v528_v58 = vpop.f32.mrf.mxu3 }
 0x2cf   :  { %v529_v59 = vadd.f32 %v528_v58, %v1040_v19 }
 0x2d1   :  { %v534_v60 = vsel %vm167_vm2, %v529_v59, -inf }
 0x2d2   :  { %535 = vmax.xlane.f32.xlu0 %v534_v60 }
 0x2d6   :  { %v531_v61 = vpop.f32.mrf.mxu3 }
 0x2d7   :  { %v532_v62 = vadd.f32 %v531_v61, %v1044_v23 }
 0x2d9   :  { %v537_v63 = vsel %vm167_vm2, %v532_v62, -inf }
 0x2da   :  { %778 = vrot.lane.b32.xlu2 %v1030_v11, %s959_s25  ;;  %538 = vmax.xlane.f32.xlu0 %v537_v63 }
 0x2e2   :  { %416 = vmax.xlane.f32.xlu0 %v415_v2 }
 0x2e3   :  { %773 = vrot.lane.b32.xlu1 %v1030_v11, %s960_s26 }
 0x32d   :  { %v414_v3 = vpop.xlane.xlu1 %413 }
 0x32e   :  { %v418_v4 = vsub.f32 %v407_v50, %v414_v3 }
 0x330   :  { %v420_v5 = vmul.f32 1.442695, %v418_v4 }
 0x332   :  { %788 = vpow2.f32 %v420_v5 }
 0x335   :  { %v292_v6 = vpop.xlane.xlu2 %291 }
 0x336   :  { %v296_v7 = vsub.f32 %v285_v53, %v292_v6 }
 0x338   :  { %v298_v8 = vmul.f32 1.442695, %v296_v7  ;;  %v789_v9 = vpop.eup %788 }
 0x339   :  { %v459_v10 = vsel %vm167_vm2, %v789_v9, 0.0 }
 0x33a   :  { %790 = vpow2.f32 %v298_v8  ;;  %460 = vadd.xlane.f32.xlu2 %v459_v10 }
 0x33d   :  { %v295_v12 = vpop.xlane.xlu1 %294  ;;  %v779_v13 = vpop.permute.xlu2 %778 }
 0x33e   :  { %v297_v14 = vsub.f32 %v288_v56, %v295_v12  ;;  %v780_v15 = vunpack.i.l.bf16 %v779_v13  ;;  %v781_v18 = vunpack.i.h.bf16 %v779_v13 }
 0x340   :  { %v791_v16 = vpop.eup %790  ;;  %v300_v17 = vmul.f32 1.442695, %v297_v14  ;;  %450 = vmatpush.msra.mxu1 %v780_v15 }
 0x341   :  { %720 = vmatmul.msk.f32.vlgmr.msrb.gmra.mxu2 %vm167_vm2, %v791_v16  ;;  %v337_v11 = vsel %vm167_vm2, %v791_v16, 0.0 }
 0x342   :  { %792 = vpow2.f32 %v300_v17  ;;  %451 = vmatpush.msra.mxu1 %v781_v18  ;;  %338 = vadd.xlane.f32.xlu0 %v337_v11 }
 0x343   :  { %726 = vmatmul.msk.f32.vlgmr.msra.gmra.mxu1 %vm167_vm2, %v789_v9 }
 0x345   :  { %v536_v19 = vpop.xlane.xlu0 %535 }
 0x346   :  { %v540_v22 = vsub.f32 %v529_v59, %v536_v19 }
 0x348   :  { %v793_v20 = vpop.eup %792  ;;  %v542_v24 = vmul.f32 1.442695, %v540_v22 }
 0x349   :  { %721 = vmatmul.msk.f32.gmra.mxu2 %vm167_vm2, %v793_v20  ;;  %v340_v21 = vsel %vm167_vm2, %v793_v20, 0.0 }
 0x34a   :  { %341 = vadd.xlane.f32.xlu1 %v340_v21  ;;  %794 = vpow2.f32 %v542_v24 }
 0x34d   :  { %v539_v23 = vpop.xlane.xlu0 %538 }
 0x34e   :  { %v541_v25 = vsub.f32 %v532_v62, %v539_v23 }
 0x350   :  { %v544_v30 = vmul.f32 1.442695, %v541_v25  ;;  %v795_v33 = vpop.eup %794 }
 0x351   :  { %v581_v38 = vsel %vm167_vm2, %v795_v33, 0.0 }
 0x355   :  { %v774_v26 = vpop.permute.xlu1 %773  ;;  %v417_v27 = vpop.xlane.xlu0 %416 }
 0x356   :  { %v775_v28 = vunpack.i.l.bf16 %v774_v26  ;;  %v419_v29 = vsub.f32 %v410_v1, %v417_v27  ;;  %v776_v31 = vunpack.i.h.bf16 %v774_v26 }
 0x358   :  { %v422_v32 = vmul.f32 1.442695, %v419_v29  ;;  %572 = vmatpush.msra.mxu2 %v775_v28 }
 0x35a   :  { %796 = vpow2.f32 %v422_v32  ;;  %573 = vmatpush.msra.mxu2 %v776_v31 }
 0x35b   :  { %732 = vmatmul.msk.f32.vlgmr.msra.gmra.mxu2 %vm167_vm2, %v795_v33  ;;  %798 = vpow2.f32 %v544_v30 }
 0x360   :  { %v797_v34 = vpop.eup %796 }
 0x361   :  { %727 = vmatmul.msk.f32.gmra.mxu1 %vm167_vm2, %v797_v34  ;;  %v462_v35 = vsel %vm167_vm2, %v797_v34, 0.0  ;;  %v799_v36 = vpop.eup %798 }
 0x362   :  { %463 = vadd.xlane.f32.xlu0 %v462_v35  ;;  %v584_v39 = vsel %vm167_vm2, %v799_v36, 0.0 }
 0x363   :  { %733 = vmatmul.msk.f32.gmra.mxu2 %vm167_vm2, %v799_v36 }
 0x36a   :  { %216 = vadd.xlane.f32.xlu0 %v215_v37 }
 0x372   :  { %582 = vadd.xlane.f32.xlu0 %v581_v38 }
 0x37a   :  { %585 = vadd.xlane.f32.xlu0 %v584_v39 }
 0x382   :  { %219 = vadd.xlane.f32.xlu0 %v218_v40 }
 0x3ad   :  { %v461_v41 = vpop.xlane.xlu2 %460 }
 0x3ae   :  { %800 = vrcp.f32 %v461_v41  ;;  %v476_v42 = vand.u32 2147483648, %v461_v41  ;;  %v474_v50 = vand.u32 2147483647, %v461_v41  ;;  %vm470_vm4 = vweird.f32 %v461_v41 }
 0x3b0   :  { %v477_v56 = vor.u32 1.1754944e-38, %v476_v42  ;;  %vm475_vm6 = vcmp.eq.f32.partialorder %v474_v50, 8.507059e+37 }
 0x3b4   :  { %v801_v44 = vpop.eup %800 }
 0x3b5   :  { %v339_v45 = vpop.xlane.xlu0 %338  ;;  %v466_v46 = vmul.f32 %v801_v44, %v461_v41  ;;  %vm471_vm3 = vweird.f32 %v801_v44 }
 0x3b6   :  { %802 = vrcp.f32 %v339_v45  ;;  %vm472_vm5 = vmor %vm470_vm4, %vm471_vm3  ;;  %v354_v60 = vand.u32 2147483648, %v339_v45  ;;  %v352_v63 = vand.u32 2147483647, %v339_v45  ;;  %vm348_vm8 = vweird.f32 %v339_v45 }
 0x3b7   :  { %v467_v47 = vsub.f32 1.0, %v466_v46 }
 0x3b8   :  { %v355_v3 = vor.u32 1.1754944e-38, %v354_v60  ;;  %vm353_vm10 = vcmp.eq.f32.partialorder %v352_v63, 8.507059e+37 }
 0x3b9   :  { %v468_v49 = vmul.f32 %v801_v44, %v467_v47 }
 0x3bb   :  { %v469_v53 = vadd.f32 %v801_v44, %v468_v49 }
 0x3bc   :  { %v803_v51 = vpop.eup %802 }
 0x3bd   :  { %v344_v54 = vmul.f32 %v803_v51, %v339_v45  ;;  %v342_v55 = vpop.xlane.xlu1 %341  ;;  %v473_v43 = vsel %vm472_vm5, %v801_v44, %v469_v53  ;;  %vm349_vm7 = vweird.f32 %v803_v51 }
 0x3be   :  { %804 = vrcp.f32 %v342_v55  ;;  %v478_v59 = vsel %vm475_vm6, %v477_v56, %v473_v43  ;;  %vm350_vm9 = vmor %vm348_vm8, %vm349_vm7  ;;  %v368_v9 = vand.u32 2147483648, %v342_v55  ;;  %v366_v12 = vand.u32 2147483647, %v342_v55 }
 0x3bf   :  { %v345_v57 = vsub.f32 1.0, %v344_v54  ;;  %vm362_vm12 = vweird.f32 %v342_v55 }
 0x3c0   :  { %v453_v58 = vpop.f32.mrf.mxu1  ;;  %v369_v14 = vor.u32 1.1754944e-38, %v368_v9  ;;  %vm367_vm14 = vcmp.eq.f32.partialorder %v366_v12, 8.507059e+37  ;;  %v648_v9 = vld [vmem:[#allocation8] sm:$0xff] }
 0x3c1   :  { %v493_v61 = vmul.f32 %v478_v59, %v453_v58  ;;  %v346_v62 = vmul.f32 %v803_v51, %v345_v57 }
 0x3c3   :  { %627 = vrot.lane.b32.xlu2 %v493_v61, %s961_s27  ;;  %v347_v0 = vadd.f32 %v803_v51, %v346_v62 }
 0x3c4   :  { %v805_v1 = vpop.eup %804  ;;  %v331_v2 = vpop.f32.mrf.mxu2 }
 0x3c5   :  { %v358_v4 = vmul.f32 %v805_v1, %v342_v55  ;;  %v351_v5 = vsel %vm350_vm9, %v803_v51, %v347_v0  ;;  %vm363_vm11 = vweird.f32 %v805_v1 }
 0x3c6   :  { %v356_v6 = vsel %vm353_vm10, %v355_v3, %v351_v5  ;;  %vm364_vm13 = vmor %vm362_vm12, %vm363_vm11 }
 0x3c7   :  { %v359_v7 = vsub.f32 1.0, %v358_v4  ;;  %v371_v8 = vmul.f32 %v356_v6, %v331_v2  ;;  %v651_v6 = vld [vmem:[#allocation8 + $0x18] sm:$0xff] }
 0x3c8   :  { %674 = vmatpush.msra.mxu0 %v651_v6 }
 0x3c9   :  { %619 = vrot.lane.b32.xlu0 %v371_v8, %s946_s30  ;;  %v360_v10 = vmul.f32 %v805_v1, %v359_v7  ;;  %v650_v7 = vld [vmem:[#allocation8 + $0x10] sm:$0xff]  ;;  %v649_v8 = vld [vmem:[#allocation8 + $0x8] sm:$0xff] }
 0x3ca   :  { %675 = vmatpush.msra.mxu0 %v650_v7 }
 0x3cb   :  { %v361_v13 = vadd.f32 %v805_v1, %v360_v10 }
 0x3cc   :  { %v334_v16 = vpop.f32.mrf.mxu2  ;;  %676 = vmatpush.msra.mxu0 %v649_v8 }
 0x3cd   :  { %v365_v15 = vsel %vm364_vm13, %v805_v1, %v361_v13 }
 0x3ce   :  { %v370_v17 = vsel %vm367_vm14, %v369_v14, %v365_v15  ;;  %677 = vmatpush.msra.mxu0 %v648_v9 }
 0x3cf   :  { %v372_v18 = vmul.f32 %v370_v17, %v334_v16 }
 0x3d1   :  { %621 = vrot.lane.b32.xlu0 %v372_v18, %s946_s30 }
 0x3d5   :  { %v464_v11 = vpop.xlane.xlu0 %463 }
 0x3d6   :  { %806 = vrcp.f32 %v464_v11  ;;  %v490_v23 = vand.u32 2147483648, %v464_v11  ;;  %v488_v25 = vand.u32 2147483647, %v464_v11  ;;  %vm484_vm3 = vweird.f32 %v464_v11 }
 0x3d8   :  { %v491_v28 = vor.u32 1.1754944e-38, %v490_v23  ;;  %vm489_vm5 = vcmp.eq.f32.partialorder %v488_v25, 8.507059e+37 }
 0x3dc   :  { %v807_v19 = vpop.eup %806 }
 0x3dd   :  { %v480_v20 = vmul.f32 %v807_v19, %v464_v11  ;;  %v217_v21 = vpop.xlane.xlu0 %216  ;;  %vm485_vm15 = vweird.f32 %v807_v19 }
 0x3de   :  { %808 = vrcp.f32 %v217_v21  ;;  %vm486_vm4 = vmor %vm484_vm3, %vm485_vm15  ;;  %v456_v32 = vpop.f32.mrf.mxu1  ;;  %v232_v37 = vand.u32 2147483648, %v217_v21  ;;  %v230_v38 = vand.u32 2147483647, %v217_v21  ;;  %vm226_vm7 = vweird.f32 %v217_v21  ;;  %v575_v43 = vpop.f32.mrf.mxu2 }
 0x3df   :  { %v481_v22 = vsub.f32 1.0, %v480_v20 }
 0x3e0   :  { %v233_v41 = vor.u32 1.1754944e-38, %v232_v37  ;;  %vm231_vm9 = vcmp.eq.f32.partialorder %v230_v38, 8.507059e+37 }
 0x3e1   :  { %v482_v24 = vmul.f32 %v807_v19, %v481_v22 }
 0x3e3   :  { %v483_v26 = vadd.f32 %v807_v19, %v482_v24 }
 0x3e4   :  { %v809_v27 = vpop.eup %808 }
 0x3e5   :  { %v222_v29 = vmul.f32 %v809_v27, %v217_v21  ;;  %v487_v30 = vsel %vm486_vm4, %v807_v19, %v483_v26  ;;  %v583_v31 = vpop.xlane.xlu0 %582  ;;  %vm227_vm6 = vweird.f32 %v809_v27 }
 0x3e6   :  { %v492_v33 = vsel %vm489_vm5, %v491_v28, %v487_v30  ;;  %810 = vrcp.f32 %v583_v31  ;;  %vm228_vm8 = vmor %vm226_vm7, %vm227_vm6  ;;  %v598_v51 = vand.u32 2147483648, %v583_v31  ;;  %v596_v53 = vand.u32 2147483647, %v583_v31  ;;  %v578_v3 = vpop.f32.mrf.mxu2 }
 0x3e7   :  { %v223_v34 = vsub.f32 1.0, %v222_v29  ;;  %v494_v35 = vmul.f32 %v492_v33, %v456_v32  ;;  %vm592_vm11 = vweird.f32 %v583_v31 }
 0x3e8   :  { %v599_v56 = vor.u32 1.1754944e-38, %v598_v51  ;;  %vm597_vm13 = vcmp.eq.f32.partialorder %v596_v53, 8.507059e+37 }
 0x3e9   :  { %v224_v36 = vmul.f32 %v809_v27, %v223_v34  ;;  %629 = vrot.lane.b32.xlu2 %v494_v35, %s961_s27  ;;  %v783_v34 = vld [vmem:[%s1133_s5] ss:$0 sm:$0xff] }
 0x3eb   :  { %v225_v39 = vadd.f32 %v809_v27, %v224_v36 }
 0x3ec   :  { %v811_v40 = vpop.eup %810 }
 0x3ed   :  { %v588_v44 = vmul.f32 %v811_v40, %v583_v31  ;;  %v586_v45 = vpop.xlane.xlu0 %585  ;;  %v229_v46 = vsel %vm228_vm8, %v809_v27, %v225_v39  ;;  %vm593_vm10 = vweird.f32 %v811_v40 }
 0x3ee   :  { %812 = vrcp.f32 %v586_v45  ;;  %v234_v49 = vsel %vm231_vm9, %v233_v41, %v229_v46  ;;  %vm594_vm12 = vmor %vm592_vm11, %vm593_vm10  ;;  %v612_v61 = vand.u32 2147483648, %v586_v45  ;;  %vm606_vm15 = vweird.f32 %v586_v45 }
 0x3ef   :  { %v589_v47 = vsub.f32 1.0, %v588_v44  ;;  %v249_v42 = vmul.f32 %v234_v49, %v1103_v52  ;;  %v610_v52 = vand.u32 2147483647, %v586_v45  ;;  %vm645_vm9 = vcmask 195584  }
 0x3f0   :  { %v613_v1 = vor.u32 1.1754944e-38, %v612_v61 }
 0x3f1   :  { %v590_v50 = vmul.f32 %v811_v40, %v589_v47  ;;  %vm611_vm4 = vcmp.eq.f32.partialorder %v610_v52, 8.507059e+37 }
 0x3f3   :  { %v591_v54 = vadd.f32 %v811_v40, %v590_v50 }
 0x3f4   :  { %v813_v55 = vpop.eup %812 }
 0x3f5   :  { %v602_v57 = vmul.f32 %v813_v55, %v586_v45  ;;  %v595_v58 = vsel %vm594_vm12, %v811_v40, %v591_v54  ;;  %vm607_vm14 = vweird.f32 %v813_v55  ;;  %v220_v10 = vpop.xlane.xlu0 %219 }
 0x3f6   :  { %v600_v60 = vsel %vm597_vm13, %v599_v56, %v595_v58  ;;  %vm608_vm3 = vmor %vm606_vm15, %vm607_vm14  ;;  %814 = vrcp.f32 %v220_v10  ;;  %v246_v18 = vand.u32 2147483648, %v220_v10  ;;  %vm240_vm6 = vweird.f32 %v220_v10 }
 0x3f7   :  { %v603_v59 = vsub.f32 1.0, %v602_v57  ;;  %v615_v62 = vmul.f32 %v600_v60, %v575_v43  ;;  %v244_v11 = vand.u32 2147483647, %v220_v10 }
 0x3f8   :  { %v247_v21 = vor.u32 1.1754944e-38, %v246_v18 }
 0x3f9   :  { %v604_v63 = vmul.f32 %v813_v55, %v603_v59  ;;  %635 = vrot.lane.b32.xlu1 %v615_v62, %s962_s28  ;;  %vm245_vm8 = vcmp.eq.f32.partialorder %v244_v11, 8.507059e+37 }
 0x3fb   :  { %v605_v0 = vadd.f32 %v813_v55, %v604_v63 }
 0x3fc   :  { %v815_v12 = vpop.eup %814 }
 0x3fd   :  { %v609_v2 = vsel %vm608_vm3, %v813_v55, %v605_v0  ;;  %v236_v13 = vmul.f32 %v815_v12, %v220_v10  ;;  %vm241_vm5 = vweird.f32 %v815_v12 }
 0x3fe   :  { %v614_v4 = vsel %vm611_vm4, %v613_v1, %v609_v2  ;;  %vm242_vm7 = vmor %vm240_vm6, %vm241_vm5 }
 0x3ff   :  { %v616_v5 = vmul.f32 %v614_v4, %v578_v3  ;;  %v237_v14 = vsub.f32 1.0, %v236_v13 }
 0x401   :  { %637 = vrot.lane.b32.xlu0 %v616_v5, %s962_s28  ;;  %v238_v15 = vmul.f32 %v815_v12, %v237_v14 }
 0x403   :  { %v239_v17 = vadd.f32 %v815_v12, %v238_v15 }
 0x405   :  { %v243_v20 = vsel %vm242_vm7, %v815_v12, %v239_v17 }
 0x406   :  { %v248_v23 = vsel %vm245_vm8, %v247_v21, %v243_v20 }
 0x407   :  { %v250_v28 = vmul.f32 %v248_v23, %v1071_v48 }
 0x41d   :  { %v628_v19 = vpop.permute.xlu2 %627 }
 0x43b   :  { %v620_v16 = vpop.permute.xlu0 %619 }
 0x43c   :  { %v641_v22 = vsel %vm135_vm1, %v249_v42, %v620_v16 }
 0x43d   :  { %v643_v26 = vsel %vm167_vm2, %v641_v22, %v628_v19 }
 0x443   :  { %v622_v24 = vpop.permute.xlu0 %621  ;;  %v630_v29 = vpop.permute.xlu2 %629 }
 0x444   :  { %v642_v30 = vsel %vm135_vm1, %v250_v28, %v622_v24 }
 0x445   :  { %v644_v32 = vsel %vm167_vm2, %v642_v30, %v630_v29 }
 0x46b   :  { %v636_v25 = vpop.permute.xlu1 %635 }
 0x46c   :  { %v646_v27 = vsel %vm645_vm9, %v643_v26, %v636_v25 }
 0x46d   :  { %734 = vmatmul.msk.f32.vlgmr.msra.gmra.mxu0 %vm97_vm0, %v646_v27 }
 0x473   :  { %v638_v31 = vpop.permute.xlu0 %637 }
 0x474   :  { %v647_v33 = vsel %vm645_vm9, %v644_v32, %v638_v31 }
 0x475   :  { %735 = vmatmul.msk.f32.gmra.mxu0 %vm97_vm0, %v647_v33 }
 0x4ea   :  { %v679_v35 = vpop.f32.mrf.mxu0 }
 0x4eb   :  { %v680_v36 = vadd.f32 %v783_v34, %v679_v35 }
 0x4ed   :  { %685 = vst.msk [vmem:[#allocation10] sm:$0xff] %vm97_vm0, %v680_v36 }
 0x4f2   :  { %v682_v48 = vpop.f32.mrf.mxu0 }
 0x4f3   :  { %v683_v37 = vadd.f32 %v783_v34, %v682_v48 }
 0x4f5   :  { %686 = vst.msk [vmem:[#allocation10 + $0x8] sm:$0xff] %vm97_vm0, %v683_v37 }
 0x4f6   :  { %699 = dma.vmem_to_hbm [thread:$0]  %s692_s10, 256, %s694_s11, [#allocation4], %s945_s29, %s945_s29, %s946_s30  }
 0x4f7   :  { %942 = dma.done.wait [#allocation4], 256  }
 0x4f8   :  { %943 = vsyncadd [#allocation4], 4294967040 }
 0x4f9   :  { %704 = vsyncpa [#allocation3], 1 }
 0x4fa   :  { %705 = vsyncpa [#allocation6], 1 }
 0x4fb   :  { %706 = vsyncpa [#allocation9], 1 }
 0x4fc   :  { %707 = vsyncpa [#allocation4], 1 }

</bundles_post_ra>
